<compile_context>
chip_gen: v7x
topology: tpu7x:2x2x1
jax: 0.10.0
libtpu: 0.0.40
codegen_flags: <defaults>
</compile_context>

<pallas_src>
import math
import functools

import numpy as np
import jax
import jax.numpy as jnp
from jax.experimental import pallas as pl
from jax.experimental.pallas import tpu as pltpu


def _gaussian_1d(window_size: int, sigma: float) -> np.ndarray:
    g = np.array(
        [math.exp(-((x - window_size // 2) ** 2) / float(2 * sigma ** 2))
         for x in range(window_size)],
        dtype=np.float64,
    )
    g = g / g.sum()
    return g.astype(np.float32)


def _conv_toeplitz(n: int, gauss: np.ndarray) -> np.ndarray:
    """Banded Toeplitz T (n, n) with T[i, j] = g[i - j + pad] (zero padding
    at the borders is implicit: out-of-range taps are simply absent)."""
    K = gauss.shape[0]
    pad = K // 2
    T = np.zeros((n, n), dtype=np.float32)
    for j in range(n):
        for d in range(K):
            i = j + d - pad
            if 0 <= i < n:
                T[i, j] = gauss[d]
    return T


def _ssim_plane_kernel(tw_ref, th_ref, x1_ref, x2_ref, sums_ref):
    """One grid step: SSIM partial sum for a single (H, W) image plane.

    tw_ref: (W, W) horizontal Toeplitz (x @ Tw)      -- resident, constant map
    th_ref: (H, H) vertical   Toeplitz (Th @ z)      -- resident, constant map
    x1_ref/x2_ref: (1, H, W) plane tiles
    sums_ref: (1, 1, 128) per-plane sum broadcast across lanes
    """
    a = x1_ref[0].astype(jnp.float32)          # (H, W)
    b = x2_ref[0].astype(jnp.float32)
    tw = tw_ref[...]                           # (W, W)
    th = th_ref[...]                           # (H, H)

    def sep_conv(f):
        # Horizontal then vertical pass, both on the MXU, f32 accumulation.
        z = jnp.dot(f, tw, preferred_element_type=jnp.float32)
        return jnp.dot(th, z, preferred_element_type=jnp.float32)

    # Fold mu/sigma terms immediately so few plane-sized slabs stay live.
    mu1 = sep_conv(a)
    mu2 = sep_conv(b)
    mu1_sq = mu1 * mu1
    mu2_sq = mu2 * mu2
    mu1_mu2 = mu1 * mu2
    sigma1_sq = sep_conv(a * a) - mu1_sq
    sigma2_sq = sep_conv(b * b) - mu2_sq
    sigma12 = sep_conv(a * b) - mu1_mu2

    C1 = 0.01 ** 2
    C2 = 0.03 ** 2
    ssim_map = ((2.0 * mu1_mu2 + C1) * (2.0 * sigma12 + C2)) / (
        (mu1_sq + mu2_sq + C1) * (sigma1_sq + sigma2_sq + C2)
    )

    # Reduce over W (lane axis, XLU) first, then over H.
    row = jnp.sum(ssim_map, axis=1, keepdims=True)       # (H, 1)
    total = jnp.sum(row, axis=0, keepdims=True)          # (1, 1)
    sums_ref[...] = jnp.broadcast_to(total.reshape(1, 1, 1), (1, 1, 128))


def ssim_pallas(img1, img2, window_size=11, size_average=True):
    assert img1.shape == img2.shape and img1.ndim == 4
    N, C, H, W = img1.shape
    P = N * C
    gauss = _gaussian_1d(window_size, 1.5)

    # Toeplitz operators (zero "SAME" padding baked into the bands).
    tw = jnp.asarray(_conv_toeplitz(W, gauss))        # apply as  x @ Tw
    th = jnp.asarray(_conv_toeplitz(H, gauss).T)      # apply as  Th @ z

    # Free reshape (no transpose / extra HBM round trip): planes lead, W in lanes.
    x1 = jnp.reshape(img1, (P, H, W))
    x2 = jnp.reshape(img2, (P, H, W))

    # VMEM budget: ~16 live plane-sized f32 slabs (double-buffered inputs,
    # a/b, conv outputs, elementwise temps) + the two resident Toeplitz mats.
    plane_bytes = H * W * 4
    need = 16 * plane_bytes + 2 * 2 * (H * H + W * W) * 4 + (2 << 20)
    try:
        info = pltpu.get_tpu_info()
        vmem_cap = getattr(info, "vmem_capacity_bytes", None) or (64 << 20)
    except Exception:
        vmem_cap = 64 << 20                       # conservative: v7x capacity
    vmem_limit = int(min(max(need, 32 << 20), (vmem_cap * 3) // 4))

    plane_sums = pl.pallas_call(
        _ssim_plane_kernel,
        out_shape=jax.ShapeDtypeStruct((P, 1, 128), jnp.float32),
        grid_spec=pltpu.PrefetchScalarGridSpec(
            num_scalar_prefetch=0,
            grid=(P,),
            in_specs=[
                pl.BlockSpec((W, W), lambda i: (0, 0)),       # Tw (resident)
                pl.BlockSpec((H, H), lambda i: (0, 0)),       # Th (resident)
                pl.BlockSpec((1, H, W), lambda i: (i, 0, 0)),  # img1 plane
                pl.BlockSpec((1, H, W), lambda i: (i, 0, 0)),  # img2 plane
            ],
            out_specs=pl.BlockSpec((1, 1, 128), lambda i: (i, 0, 0)),
        ),
        compiler_params=pltpu.CompilerParams(
            dimension_semantics=("parallel",),   # each plane is independent
            vmem_limit_bytes=vmem_limit,
        ),
    )(tw, th, x1, x2)

    plane_sums = plane_sums[:, 0, 0]                          # (N*C,)
    if size_average:
        return jnp.sum(plane_sums) / float(P * H * W)
    else:
        # mean(1).mean(1).mean(1) over NCHW == per-sample mean over (C, H, W)
        return jnp.sum(plane_sums.reshape(N, C), axis=1) / float(C * H * W)


# ---- pure-JAX reference (correctness sanity check) ----
def _ssim_reference(img1, img2, window_size=11, size_average=True):
    N, C, H, W = img1.shape
    pad = window_size // 2
    g = jnp.asarray(_gaussian_1d(window_size, 1.5))
    w2d = jnp.outer(g, g)
    win = jnp.broadcast_to(w2d[None, None], (C, 1, window_size, window_size))

    def conv(x):
        return jax.lax.conv_general_dilated(
            x, win, (1, 1), [(pad, pad), (pad, pad)],
            dimension_numbers=("NCHW", "OIHW", "NCHW"),
            feature_group_count=C,
        )

    mu1, mu2 = conv(img1), conv(img2)
    mu1_sq, mu2_sq, mu1_mu2 = mu1 ** 2, mu2 ** 2, mu1 * mu2
    s1 = conv(img1 * img1) - mu1_sq
    s2 = conv(img2 * img2) - mu2_sq
    s12 = conv(img1 * img2) - mu1_mu2
    C1, C2 = 0.01 ** 2, 0.03 ** 2
    m = (2 * mu1_mu2 + C1) * (2 * s12 + C2) / ((mu1_sq + mu2_sq + C1) * (s1 + s2 + C2))
    return jnp.mean(m) if size_average else jnp.mean(m, axis=(1, 2, 3))


if __name__ == "__main__":
    key = jax.random.PRNGKey(0)
    k1, k2 = jax.random.split(key)
    N, C, H, W = 2, 4, 16, 16
    img1 = jax.random.uniform(k1, (N, C, H, W), dtype=jnp.float32)
    img2 = jax.random.uniform(k2, (N, C, H, W), dtype=jnp.float32)

    # size_average=True path (module default)
    out_mean = ssim_pallas(img1, img2, window_size=11, size_average=True)
    out_mean = jax.block_until_ready(out_mean)
    ref_mean = _ssim_reference(img1, img2, window_size=11, size_average=True)
    assert jnp.allclose(out_mean, ref_mean, atol=5e-5), (out_mean, ref_mean)

    # size_average=False path (per-sample means)
    out_per = ssim_pallas(img1, img2, window_size=11, size_average=False)
    out_per = jax.block_until_ready(out_per)
    ref_per = _ssim_reference(img1, img2, window_size=11, size_average=False)
    assert jnp.allclose(out_per, ref_per, atol=5e-5), (out_per, ref_per)

    print("KERNEL_OK")
</pallas_src>

<mosaic_0001>
module attributes {stable_mosaic.version = 11 : i64} {
  func.func @_ssim_plane_kernel(%arg0: i32, %arg1: memref<16x16xf32, #tpu.memory_space<vmem>>, %arg2: memref<16x16xf32, #tpu.memory_space<vmem>>, %arg3: memref<1x16x16xf32, #tpu.memory_space<vmem>>, %arg4: memref<1x16x16xf32, #tpu.memory_space<vmem>>, %arg5: memref<1x1x128xf32, #tpu.memory_space<vmem>>) attributes {dimension_semantics = [#tpu.dimension_semantics<parallel>], iteration_bounds = array<i64: 8>, scalar_prefetch = 0 : i64, scratch_operands = 0 : i64, tpu.core_type = #tpu.core_type<tc>, window_params = [{pipeline_mode = #tpu.pipeline_mode<synchronous>, transform_indices = @transform_0, window_bounds = array<i64: 16, 16>}, {pipeline_mode = #tpu.pipeline_mode<synchronous>, transform_indices = @transform_1, window_bounds = array<i64: 16, 16>}, {transform_indices = @transform_2, window_bounds = array<i64: 1, 16, 16>}, {transform_indices = @transform_3, window_bounds = array<i64: 1, 16, 16>}, {transform_indices = @transform_4, window_bounds = array<i64: 1, 1, 128>}]} {
    %c0 = arith.constant 0 : index
    %c0_0 = arith.constant 0 : index
    %c0_1 = arith.constant 0 : index
    %0 = vector.load %arg3[%c0, %c0_0, %c0_1] : memref<1x16x16xf32, #tpu.memory_space<vmem>>, vector<1x16x16xf32>
    %1 = vector.shape_cast %0 : vector<1x16x16xf32> to vector<16x16xf32>
    %c0_2 = arith.constant 0 : index
    %c0_3 = arith.constant 0 : index
    %c0_4 = arith.constant 0 : index
    %2 = vector.load %arg4[%c0_2, %c0_3, %c0_4] : memref<1x16x16xf32, #tpu.memory_space<vmem>>, vector<1x16x16xf32>
    %3 = vector.shape_cast %2 : vector<1x16x16xf32> to vector<16x16xf32>
    %c0_5 = arith.constant 0 : index
    %c0_6 = arith.constant 0 : index
    %4 = vector.load %arg1[%c0_5, %c0_6] : memref<16x16xf32, #tpu.memory_space<vmem>>, vector<16x16xf32>
    %c0_7 = arith.constant 0 : index
    %c0_8 = arith.constant 0 : index
    %5 = vector.load %arg2[%c0_7, %c0_8] : memref<16x16xf32, #tpu.memory_space<vmem>>, vector<16x16xf32>
    %cst = arith.constant dense<0.000000e+00> : vector<16x16xf32>
    %6 = tpu.matmul %1, %4, %cst {dimension_numbers = #tpu.dot_dimension_numbers<[1], [0], [0], [1], [0, 0, 1, 1], [], []>} : vector<16x16xf32>, vector<16x16xf32>, vector<16x16xf32> -> vector<16x16xf32>
    %cst_9 = arith.constant dense<0.000000e+00> : vector<16x16xf32>
    %7 = tpu.matmul %5, %6, %cst_9 {dimension_numbers = #tpu.dot_dimension_numbers<[1], [0], [0], [1], [0, 0, 1, 1], [], []>} : vector<16x16xf32>, vector<16x16xf32>, vector<16x16xf32> -> vector<16x16xf32>
    %cst_10 = arith.constant dense<0.000000e+00> : vector<16x16xf32>
    %8 = tpu.matmul %3, %4, %cst_10 {dimension_numbers = #tpu.dot_dimension_numbers<[1], [0], [0], [1], [0, 0, 1, 1], [], []>} : vector<16x16xf32>, vector<16x16xf32>, vector<16x16xf32> -> vector<16x16xf32>
    %cst_11 = arith.constant dense<0.000000e+00> : vector<16x16xf32>
    %9 = tpu.matmul %5, %8, %cst_11 {dimension_numbers = #tpu.dot_dimension_numbers<[1], [0], [0], [1], [0, 0, 1, 1], [], []>} : vector<16x16xf32>, vector<16x16xf32>, vector<16x16xf32> -> vector<16x16xf32>
    %10 = arith.mulf %7, %7 : vector<16x16xf32>
    %11 = arith.mulf %9, %9 : vector<16x16xf32>
    %12 = arith.mulf %7, %9 : vector<16x16xf32>
    %13 = arith.mulf %1, %1 : vector<16x16xf32>
    %cst_12 = arith.constant dense<0.000000e+00> : vector<16x16xf32>
    %14 = tpu.matmul %13, %4, %cst_12 {dimension_numbers = #tpu.dot_dimension_numbers<[1], [0], [0], [1], [0, 0, 1, 1], [], []>} : vector<16x16xf32>, vector<16x16xf32>, vector<16x16xf32> -> vector<16x16xf32>
    %cst_13 = arith.constant dense<0.000000e+00> : vector<16x16xf32>
    %15 = tpu.matmul %5, %14, %cst_13 {dimension_numbers = #tpu.dot_dimension_numbers<[1], [0], [0], [1], [0, 0, 1, 1], [], []>} : vector<16x16xf32>, vector<16x16xf32>, vector<16x16xf32> -> vector<16x16xf32>
    %16 = arith.subf %15, %10 : vector<16x16xf32>
    %17 = arith.mulf %3, %3 : vector<16x16xf32>
    %cst_14 = arith.constant dense<0.000000e+00> : vector<16x16xf32>
    %18 = tpu.matmul %17, %4, %cst_14 {dimension_numbers = #tpu.dot_dimension_numbers<[1], [0], [0], [1], [0, 0, 1, 1], [], []>} : vector<16x16xf32>, vector<16x16xf32>, vector<16x16xf32> -> vector<16x16xf32>
    %cst_15 = arith.constant dense<0.000000e+00> : vector<16x16xf32>
    %19 = tpu.matmul %5, %18, %cst_15 {dimension_numbers = #tpu.dot_dimension_numbers<[1], [0], [0], [1], [0, 0, 1, 1], [], []>} : vector<16x16xf32>, vector<16x16xf32>, vector<16x16xf32> -> vector<16x16xf32>
    %20 = arith.subf %19, %11 : vector<16x16xf32>
    %21 = arith.mulf %1, %3 : vector<16x16xf32>
    %cst_16 = arith.constant dense<0.000000e+00> : vector<16x16xf32>
    %22 = tpu.matmul %21, %4, %cst_16 {dimension_numbers = #tpu.dot_dimension_numbers<[1], [0], [0], [1], [0, 0, 1, 1], [], []>} : vector<16x16xf32>, vector<16x16xf32>, vector<16x16xf32> -> vector<16x16xf32>
    %cst_17 = arith.constant dense<0.000000e+00> : vector<16x16xf32>
    %23 = tpu.matmul %5, %22, %cst_17 {dimension_numbers = #tpu.dot_dimension_numbers<[1], [0], [0], [1], [0, 0, 1, 1], [], []>} : vector<16x16xf32>, vector<16x16xf32>, vector<16x16xf32> -> vector<16x16xf32>
    %24 = arith.subf %23, %12 : vector<16x16xf32>
    %cst_18 = arith.constant 2.000000e+00 : f32
    %25 = vector.broadcast %cst_18 : f32 to vector<16x16xf32>
    %26 = arith.mulf %25, %12 : vector<16x16xf32>
    %cst_19 = arith.constant 9.99999974E-5 : f32
    %27 = vector.broadcast %cst_19 : f32 to vector<16x16xf32>
    %28 = arith.addf %26, %27 : vector<16x16xf32>
    %cst_20 = arith.constant 2.000000e+00 : f32
    %29 = vector.broadcast %cst_20 : f32 to vector<16x16xf32>
    %30 = arith.mulf %29, %24 : vector<16x16xf32>
    %cst_21 = arith.constant 8.99999984E-4 : f32
    %31 = vector.broadcast %cst_21 : f32 to vector<16x16xf32>
    %32 = arith.addf %30, %31 : vector<16x16xf32>
    %33 = arith.mulf %28, %32 : vector<16x16xf32>
    %34 = arith.addf %10, %11 : vector<16x16xf32>
    %cst_22 = arith.constant 9.99999974E-5 : f32
    %35 = vector.broadcast %cst_22 : f32 to vector<16x16xf32>
    %36 = arith.addf %34, %35 : vector<16x16xf32>
    %37 = arith.addf %16, %20 : vector<16x16xf32>
    %cst_23 = arith.constant 8.99999984E-4 : f32
    %38 = vector.broadcast %cst_23 : f32 to vector<16x16xf32>
    %39 = arith.addf %37, %38 : vector<16x16xf32>
    %40 = arith.mulf %36, %39 : vector<16x16xf32>
    %41 = arith.divf %33, %40 : vector<16x16xf32>
    %cst_24 = arith.constant dense<0.000000e+00> : vector<16xf32>
    %42 = vector.multi_reduction <add>, %41, %cst_24 [1] : vector<16x16xf32> to vector<16xf32>
    %43 = vector.shape_cast %42 : vector<16xf32> to vector<16x1xf32>
    %cst_25 = arith.constant dense<0.000000e+00> : vector<1xf32>
    %44 = vector.multi_reduction <add>, %43, %cst_25 [0] : vector<16x1xf32> to vector<1xf32>
    %45 = vector.shape_cast %44 : vector<1xf32> to vector<1x1xf32>
    %46 = vector.shape_cast %45 : vector<1x1xf32> to vector<1x1x1xf32>
    %47 = vector.shape_cast %46 : vector<1x1x1xf32> to vector<1x1x1xf32>
    %48 = vector.broadcast %47 : vector<1x1x1xf32> to vector<1x1x128xf32>
    %c0_26 = arith.constant 0 : index
    %c0_27 = arith.constant 0 : index
    %c0_28 = arith.constant 0 : index
    %49 = vector.load %arg5[%c0_26, %c0_27, %c0_28] : memref<1x1x128xf32, #tpu.memory_space<vmem>>, vector<1x1x128xf32>
    tpu.vector_store %arg5[%c0_26, %c0_27, %c0_28], %48 {strides = array<i32>} : memref<1x1x128xf32, #tpu.memory_space<vmem>>, vector<1x1x128xf32>,
    return
  }
  func.func @transform_0(%arg0: i32) -> (i32, i32) {
    %c0_i32 = arith.constant 0 : i32
    %c0_i32_0 = arith.constant 0 : i32
    %c0_i32_1 = arith.constant 0 : i32
    return %c0_i32, %c0_i32_0 : i32, i32
  }
  func.func @transform_1(%arg0: i32) -> (i32, i32) {
    %c0_i32 = arith.constant 0 : i32
    %c0_i32_0 = arith.constant 0 : i32
    %c0_i32_1 = arith.constant 0 : i32
    return %c0_i32, %c0_i32_0 : i32, i32
  }
  func.func @transform_2(%arg0: i32) -> (i32, i32, i32) {
    %c0_i32 = arith.constant 0 : i32
    %c0_i32_0 = arith.constant 0 : i32
    %c0_i32_1 = arith.constant 0 : i32
    return %arg0, %c0_i32, %c0_i32_0 : i32, i32, i32
  }
  func.func @transform_3(%arg0: i32) -> (i32, i32, i32) {
    %c0_i32 = arith.constant 0 : i32
    %c0_i32_0 = arith.constant 0 : i32
    %c0_i32_1 = arith.constant 0 : i32
    return %arg0, %c0_i32, %c0_i32_0 : i32, i32, i32
  }
  func.func @transform_4(%arg0: i32) -> (i32, i32, i32) {
    %c0_i32 = arith.constant 0 : i32
    %c0_i32_0 = arith.constant 0 : i32
    %c0_i32_1 = arith.constant 0 : i32
    return %arg0, %c0_i32, %c0_i32_0 : i32, i32, i32
  }
}

</mosaic_0001>

<bundles_post_ra>
// kernel: tpu_custom_call.1
= control target key start
LH: loop header
LB: loop body
LE: loop exit
PB: predicated region body
PF: predicated region fallthrough
CT: control target
= control target key end

     0   :  { %s2042_s0 = inlined_call_operand.hbm [shape: f32[16,16], index: 0, kind: input, shape index: {}]   ;;  %s2043_s1 = inlined_call_operand.hbm [shape: f32[16,16], index: 1, kind: input, shape index: {}]   ;;  %s2044_s2 = inlined_call_operand.hbm [shape: f32[8,16,16], index: 2, kind: input, shape index: {}]   ;;  %s2045_s3 = inlined_call_operand.hbm [shape: f32[8,16,16], index: 3, kind: input, shape index: {}]   ;;  %s2046_s4 = inlined_call_operand.hbm [shape: f32[8,1,128], index: 4, kind: output, shape index: {}]  }
   0x1   :  { %2059 = sst [smem:[#allocation16_spill]] %s2042_s0 }
   0x2   :  { %2060 = sst [smem:[#allocation17_spill]] %s2044_s2 }
   0x3   :  { %9 = vsyncpa [#allocation3], 0 }
   0x4   :  { %10 = vsyncpa [#allocation6], 0 }
   0x5   :  { %11 = vsyncpa [#allocation4], 0 }
   0x6   :  { %13 = vsyncpa [#allocation4 + $0x1], 0  ;;  %s1741_s15 = smov 0   ;;  %s1743_s16 = smov 0  }
   0x7   :  { %s1745_s17 = smov 0   ;;  %s1747_s18 = smov 0  }
   0x8 LB: > { %2061 = sst [smem:[#allocation14_spill]] %s1703_s17  ;;  %s1762_s19 = sadd.s32 4294967295, %s1707_s18   ;;  %s1707_s18 = sphi %s1747_s18, %s2093_s18   ;;  %s1703_s17 = sphi %s1745_s17, %s2090_s17   ;;  %s1699_s16 = sphi %s1743_s16, %s2092_s16   ;;  %s1695_s15 = sphi %s1741_s15, %s2091_s15  }
   0x9   : > { %s1248_s20 = sadd.s32 4294967294, %s1707_s18   ;;  %s1766_s21 = sadd.s32 1, %s1707_s18  }
   0xa   : > { %s68_s22 = sadd.s32 1, %s1703_s17  ;;  %s65_s23 = ssub.s32 %s1707_s18, %s1766_s21 }
   0xb   : > { %p75_p0 = scmp.ne.s32.totalorder %s1703_s17, %s1699_s16  ;;  %p66_p1 = scmp.eq.s32.totalorder %s65_s23, 0 }
   0xc   : > { %p76_p2 = scmp.eq.s32.totalorder %s1707_s18, 0  ;;  %p81_p3 = scmp.ne.s32.totalorder %s1699_s16, %s1695_s15 }
   0xd   : > { %p2047_p4 = scmp.eq.s32.totalorder %s1762_s19, 0  ;;  %p131_p7 = scmp.eq.s32.totalorder %s1762_s19, 7 }
   0xe   : > { %s1778_s24 = scalar_select %p66_p1, %s1703_s17, %s68_s22  }
   0xf   : > { %p1780_p5 = por %p76_p2, %p75_p0  ;;  %p1786_p6 = por %p2047_p4, %p81_p3 }
  0x10   : > { %2062 = sst [smem:[#allocation15_spill]] %s1778_s24  ;;  %p137_p8 = scmp.eq.s32.totalorder %s1248_s20, 7 }
  0x11   : > { %s2063_s25 = scalar_select %p1780_p5, 1, 0 }
  0x12   : > { %s2064_s26 = scalar_select %p1786_p6, 1, 0 }
  0x13   : > { %p1249_p9 = scmp.ge.s32.totalorder %s1707_s18, 1  ;;  %p144_p10 = scmp.lt.s32.totalorder %s1707_s18, 9 }
  0x14   : > { %p1793_p11 = por %p131_p7, %p75_p0  ;;  %p1797_p12 = por %p137_p8, %p81_p3 }
  0x15   : > { %p1801_p13 = pnand %p1249_p9, %p144_p10  ;;  %s1709_s30 = smov [#allocation2]  }
  0x16   : > { %s2065_s27 = scalar_select %p1793_p11, 1, 0 }
  0x17   : > { %s2066_s28 = scalar_select %p1797_p12, 1, 0 }
  0x18   : > { %s2067_s29 = scalar_select %p1801_p13, 1, 0 }
  0x19   : > { %p1453_p1 = pneg %p1801_p13  ;;  %s156_s5 = sshll.u32 %s1709_s30, 4  ;;  %s157_s5 = int_to_ptr.vmem [resolvable:$true] %s156_s5 }
  0x1a   : > { %s183_s7 = sand.u32 1, %s1707_s18   ;;  %s2069_s0 = sld [smem:[#allocation16_spill]] }
  0x1b   : > { %p1809_p2 = pnand %p1453_p1, %p2047_p4 }
  0x1d   : > { %p2054_p7 = pneg %p1809_p2 }
  0x20   : > { %s1517_s10 = scalar_lea.hbm %s2069_s0, 256 }
  0x21   : > { %p1518_p3 = scmp.ne.s32.totalorder %s2069_s0, %s1517_s10  ;;  %p1524_p10 = scmp.lt.u32.totalorder %s1517_s10, %s2069_s0 }
  0x23   : > { %p1520_p8 = pnand %p2054_p7, %p1518_p3 }
  0x25   : > { %p1521_p9 = pneg %p1520_p8 }
  0x27   : > { %p1526_p1 = pnand %p1524_p10, %p1521_p9 }
  0x29   : > { %1529 = shalt.err (!%p1526_p1)
}
  0x2a   : > { %s1530_s20 = scalar_lea.vmem %s157_s5, 256  ;;  %p1538_p11 = scmp.lt.s32.totalorder %s157_s5, %s157_s5 }
  0x2b   : > { %p1531_p4 = scmp.ne.s32.totalorder %s157_s5, %s1530_s20  ;;  %p1539_p6 = scmp.lt.s32.totalorder %s1530_s20, %s1530_s20 }
  0x2d   : > { %p1533_p0 = pnand %p1531_p4, %p2054_p7  ;;  %p1540_p13 = por %p1539_p6, %p1538_p11 }
  0x2f   : > { %p1534_p12 = pneg %p1533_p0 }
  0x31   : > { %p1541_p5 = pnand %p1540_p13, %p1534_p12 }
  0x33   : > { %1544 = shalt.err (!%p1541_p5)
}
  0x34   : > { %s2052_s22 = smov 128   ;;  %s1711_s23 = smov 8  }
  0x35   : > { %1456 = dma.hbm_to_vmem [thread:$0]  (!%p1809_p2), %s2069_s0, 256, %s157_s5, [#allocation3], %s2052_s22, %s2052_s22, %s1711_s23  }
  0x36   : > { %p2070_p4 = scmp.ne.s32.totalorder %s2063_s25, 0  ;;  %p2071_p6 = scmp.lt.s32.totalorder %s1707_s18, 8 }
  0x37   : > { %s185_s10 = sand.u32 1, %s1703_s17   ;;  %s2051_s12 = sshll.u32 %s1707_s18, 8 }
  0x38   : > { %p1844_p11 = pnand %p2071_p6, %p2070_p4  ;;  %s1849_s11 = sshll.u32 %s185_s10, 4 }
  0x39   : > { %s2073_s2 = sld [smem:[#allocation17_spill]]  ;;  %s187_s25 = scalar_lea.vmem [#allocation7], %s1849_s11 }
  0x3a   : > { %s2072_s9 = scalar_select %p1844_p11, 1, 0 }
  0x3b   : > { %s194_s5 = sshll.u32 %s187_s25, 4  ;;  %s1862_s30 = scalar_lea.sflag [#allocation3], %s183_s7  ;;  %s1860_s5 = int_to_ptr.vmem [resolvable:$true] %s194_s5 }
  0x3c   : > { %p2056_p12 = pneg %p1844_p11 }
  0x3f   : > { %s1857_s20 = scalar_lea.hbm %s2073_s2, %s2051_s12  ;;  %s1550_s14 = scalar_lea.hbm %s2073_s2, 2048 }
  0x40   : > { %s1545_s8 = scalar_lea.hbm %s1857_s20, 256  ;;  %p1551_p3 = scmp.lt.u32.totalorder %s1857_s20, %s2073_s2 }
  0x41   : > { %p1546_p5 = scmp.ne.s32.totalorder %s1857_s20, %s1545_s8  ;;  %p1552_p8 = scmp.lt.u32.totalorder %s1550_s14, %s1545_s8 }
  0x42   : > { %p1554_p10 = scmp.lt.u32.totalorder %s1545_s8, %s1857_s20 }
  0x43   : > { %p1548_p13 = pnand %p2056_p12, %p1546_p5  ;;  %p1553_p9 = por %p1552_p8, %p1551_p3 }
  0x45   : > { %p1549_p0 = pneg %p1548_p13  ;;  %p1555_p1 = por %p1554_p10, %p1553_p9 }
  0x47   : > { %p1556_p4 = pnand %p1555_p1, %p1549_p0 }
  0x49   : > { %1559 = shalt.err (!%p1556_p4)
}
  0x4a   : > { %s1560_s7 = scalar_lea.vmem %s1860_s5, 256  ;;  %s1712_s25 = smov [#allocation7]  }
  0x4b   : > { %p1561_p6 = scmp.ne.s32.totalorder %s1860_s5, %s1560_s7  ;;  %s1565_s10 = sshll.u32 %s1712_s25, 4  ;;  %s1566_s10 = int_to_ptr.vmem [resolvable:$false] %s1565_s10 }
  0x4c   : > { %s1567_s22 = scalar_lea.vmem %s1566_s10, 512  ;;  %p1568_p7 = scmp.lt.s32.totalorder %s1860_s5, %s1566_s10 }
  0x4d   : > { %p1563_p5 = pnand %p1561_p6, %p2056_p12  ;;  %p1569_p3 = scmp.lt.s32.totalorder %s1567_s22, %s1560_s7 }
  0x4f   : > { %p1564_p13 = pneg %p1563_p5  ;;  %p1570_p8 = por %p1569_p3, %p1568_p7 }
  0x51   : > { %p1571_p9 = pnand %p1570_p8, %p1564_p13 }
  0x53   : > { %1574 = shalt.err (!%p1571_p9)
}
  0x54   : > { %s2074_s12 = smov 128   ;;  %s1713_s8 = smov [#allocation5]  }
  0x55   : > { %1463 = dma.hbm_to_vmem [thread:$0]  (!%p1844_p11), %s1857_s20, 256, %s1860_s5, %s1862_s30, %s2074_s12, %s2074_s12, %s1711_s23  }
  0x56   : > { %s169_s13 = sshll.u32 %s1713_s8, 4  ;;  %s2075_s14 = sshll.u32 %s1707_s18, 8  ;;  %s170_s13 = int_to_ptr.vmem [resolvable:$true] %s169_s13 }
  0x57   : > { %s1898_s10 = scalar_lea.hbm %s2045_s3, %s2075_s14  ;;  %s1575_s2 = scalar_lea.hbm %s2043_s1, 256 }
  0x58   : > { %p1576_p7 = scmp.ne.s32.totalorder %s2043_s1, %s1575_s2  ;;  %p2076_p0 = pneg %p1809_p2 }
  0x59   : > { %p1582_p4 = scmp.lt.u32.totalorder %s1575_s2, %s2043_s1 }
  0x5a   : > { %p1578_p10 = pnand %p1576_p7, %p2076_p0 }
  0x5c   : > { %p1579_p1 = pneg %p1578_p10 }
  0x5e   : > { %p1584_p6 = pnand %p1582_p4, %p1579_p1 }
  0x60   : > { %1587 = shalt.err (!%p1584_p6)
}
  0x61   : > { %s1588_s8 = scalar_lea.vmem %s170_s13, 256  ;;  %p2077_p13 = pmov %p2076_p0 }
  0x62   : > { %p1589_p5 = scmp.ne.s32.totalorder %s170_s13, %s1588_s8  ;;  %p1596_p9 = scmp.lt.s32.totalorder %s170_s13, %s170_s13 }
  0x63   : > { %p1597_p12 = scmp.lt.s32.totalorder %s1588_s8, %s1588_s8 }
  0x64   : > { %p1591_p3 = pnand %p1589_p5, %p2077_p13 }
  0x65   : > { %p1598_p11 = por %p1597_p12, %p1596_p9 }
  0x66   : > { %p1592_p8 = pneg %p1591_p3 }
  0x68   : > { %p1599_p0 = pnand %p1598_p11, %p1592_p8 }
  0x6a   : > { %1602 = shalt.err (!%p1599_p0)
}
  0x6b   : > { %1459 = dma.hbm_to_vmem [thread:$0]  (!%p1809_p2), %s2043_s1, 256, %s170_s13, [#allocation6], %s2074_s12, %s2074_s12, %s1711_s23  }
  0x6c   : > { %s208_s17 = scalar_lea.vmem [#allocation8], %s1849_s11  ;;  %s1603_s14 = scalar_lea.hbm %s1898_s10, 256 }
  0x6d   : > { %s215_s24 = sshll.u32 %s208_s17, 4  ;;  %p1604_p11 = scmp.ne.s32.totalorder %s1898_s10, %s1603_s14  ;;  %s1924_s24 = int_to_ptr.vmem [resolvable:$true] %s215_s24 }
  0x6e   : > { %p2078_p12 = scmp.ne.s32.totalorder %s2072_s9, 0  ;;  %s1608_s7 = scalar_lea.hbm %s2045_s3, 2048 }
  0x6f   : > { %p1609_p4 = scmp.lt.u32.totalorder %s1898_s10, %s2045_s3  ;;  %p1610_p6 = scmp.lt.u32.totalorder %s1608_s7, %s1603_s14 }
  0x70   : > { %p2079_p7 = pneg %p2078_p12  ;;  %p1612_p5 = scmp.lt.u32.totalorder %s1603_s14, %s1898_s10 }
  0x71   : > { %p1611_p2 = por %p1610_p6, %p1609_p4 }
  0x72   : > { %p1606_p10 = pnand %p1604_p11, %p2079_p7 }
  0x73   : > { %p1613_p13 = por %p1612_p5, %p1611_p2 }
  0x74   : > { %p1607_p1 = pneg %p1606_p10 }
  0x76   : > { %p1614_p3 = pnand %p1613_p13, %p1607_p1 }
  0x78   : > { %1617 = shalt.err (!%p1614_p3)
}
  0x79   : > { %s1618_s11 = scalar_lea.vmem %s1924_s24, 256  ;;  %p2080_p9 = pmov %p2079_p7 }
  0x7a   : > { %p1619_p8 = scmp.ne.s32.totalorder %s1924_s24, %s1618_s11  ;;  %s1714_s13 = smov [#allocation8]  }
  0x7b   : > { %s1623_s5 = sshll.u32 %s1714_s13, 4  ;;  %s1624_s5 = int_to_ptr.vmem [resolvable:$false] %s1623_s5 }
  0x7c   : > { %p1621_p0 = pnand %p1619_p8, %p2080_p9  ;;  %s1625_s8 = scalar_lea.vmem %s1624_s5, 512 }
  0x7d   : > { %p1626_p7 = scmp.lt.s32.totalorder %s1924_s24, %s1624_s5  ;;  %p1627_p10 = scmp.lt.s32.totalorder %s1625_s8, %s1618_s11 }
  0x7e   : > { %p1622_p11 = pneg %p1621_p0 }
  0x7f   : > { %p1628_p4 = por %p1627_p10, %p1626_p7 }
  0x81   : > { %p1629_p6 = pnand %p1628_p4, %p1622_p11 }
  0x83   : > { %1632 = shalt.err (!%p1629_p6)
}
  0x84   : > { %1466 = dma.hbm_to_vmem [thread:$0]  (!%p2078_p12), %s1898_s10, 256, %s1924_s24, %s1862_s30, %s2074_s12, %s2074_s12, %s1711_s23  }
  0x85   : > { %p2081_p1 = scmp.ne.s32.totalorder %s2067_s29, 0 }
  0x86   : > { %p2082_p2 = scmp.eq.s32.totalorder (!%p2081_p1), %s1762_s19, 0 }
  0x87   : > { %227 = sbr.rel (%p2081_p1) target bundleno = 798 (0x31e), region = 36 }
  0x8e   : > { %1678 = dma.done.wait (%p2082_p2), [#allocation3], 256   ;;  %p2083_p5 = pmov %p2082_p2 }
  0x8f   : > { %p2084_p13 = pmov %p2082_p2 }
  0x90   : > { %1680 = vsyncadd (%p2083_p5), [#allocation3], 4294967040 }
  0x91   : > { %1682 = dma.done.wait (%p2084_p13), [#allocation6], 256   ;;  %p2085_p3 = pmov %p2082_p2 }
  0x92   : > { %s237_s9 = sand.u32 1, %s1762_s19   ;;  %s1965_s23 = sand.u32 1, %s1699_s16  }
  0x93   : > { %1684 = vsyncadd (%p2085_p3), [#allocation6], 4294967040  ;;  %s1262_s29 = sshll.u32 %s1965_s23, 4  ;;  %s238_s30 = scalar_lea.sflag [#allocation3], %s237_s9 }
  0x94   : > { %s241_s12 = scalar_lea.vmem [#allocation7], %s1262_s29  ;;  %p2086_p12 = scmp.ne.s32.totalorder %s2064_s26, 0 }
  0x96   : > { %1686 = dma.done.wait (%p2086_p12), %s238_s30, 512  }
  0x97   : > { %1688 = vsyncadd (%p2086_p12), %s238_s30, 4294966784  ;;  %vm287_vm0 = vcmask 130048   ;;  %v283_v0 = vld [vmem:[#allocation2] sm:$0xff]  ;;  %v284_v1 = vld [vmem:[#allocation2 + $0x8] sm:$0xff]  ;;  %s250_s10 = scalar_lea.vmem [#allocation8], %s1262_s29  ;;  %s1284_s26 = sshll.u32 %s1762_s19, 4 }
  0x98   : > { %v279_v2 = vld [vmem:[%s241_s12] sm:$0xff]  ;;  %v1399_v3 = vpack.c.bf16 %v284_v1, %v283_v0  ;;  %v280_v4 = vld [vmem:[%s241_s12 + $0x8] sm:$0xff]  ;;  %s278_s0 = scalar_lea.vmem [#allocation9], %s1965_s23  ;;  %s1999_s14 = scalar_lea.hbm %s2046_s4, %s1284_s26 }
  0x99   : > { %1333 = vmatprep.mubr.msk.f32.mxu0 %vm287_vm0, %v279_v2  ;;  %v281_v5 = vld [vmem:[%s250_s10] sm:$0xff]  ;;  %v612_v6 = vmul.f32 %v279_v2, %v279_v2  ;;  %v282_v7 = vld [vmem:[%s250_s10 + $0x8] sm:$0xff]  ;;  %v613_v8 = vmul.f32 %v280_v4, %v280_v4  ;;  %s1143_s2 = sshll.u32 %s278_s0, 4  ;;  %s1131_s6 = scalar_lea.sflag [#allocation4], %s1965_s23  ;;  %s2001_s2 = int_to_ptr.vmem [resolvable:$true] %s1143_s2 }
  0x9a   : > { %1400 = vmatprep.subr.bf16.mxu0 %v1399_v3  ;;  %v772_v9 = vmul.f32 %v281_v5, %v281_v5  ;;  %v773_v10 = vmul.f32 %v282_v7, %v282_v7  ;;  %v932_v11 = vmul.f32 %v281_v5, %v279_v2  ;;  %v933_v12 = vmul.f32 %v282_v7, %v280_v4  ;;  %v285_v13 = vld [vmem:[#allocation5] sm:$0xff]  ;;  %v286_v19 = vld [vmem:[#allocation5 + $0x8] sm:$0xff]  ;;  %s1633_s25 = scalar_lea.vmem %s2001_s2, 16  ;;  %p2087_p9 = scmp.ne.s32.totalorder %s2065_s27, 0 }
  0x9b   : > { %1402 = vmatpush3.bf16.msra.mxu0 %v1399_v3  ;;  %1340 = vmatprep.mubr.msk.f32.mxu1 %vm287_vm0, %v285_v13  ;;  %p1634_p8 = scmp.ne.s32.totalorder %s2001_s2, %s1633_s25  ;;  %s1715_s19 = smov [#allocation9]  }
  0x9c   : > { %1408 = vmatprep.subr.bf16.mxu0 %v1399_v3  ;;  %s1637_s7 = sshll.u32 %s1715_s19, 4  ;;  %s1638_s7 = int_to_ptr.vmem [resolvable:$false] %s1637_s7 }
  0x9d   : > { %p1635_p0 = pnand %p1634_p8, %p2087_p9  ;;  %s1639_s22 = scalar_lea.vmem %s1638_s7, 32 }
  0x9e   : > { %1334 = vmatmul.mubr.msk.f32.vlgmr.msra.gmra.mrb[0].mxu0 %vm287_vm0, %v280_v4  ;;  %p1640_p7 = scmp.lt.s32.totalorder %s2001_s2, %s1638_s7  ;;  %p1641_p10 = scmp.lt.s32.totalorder %s1639_s22, %s1633_s25 }
  0x9f   : > { %1410 = vmatpush3.bf16.msra.mxu0 %v1399_v3  ;;  %1347 = vmatprep.mubr.msk.f32.mxu0 %vm287_vm0, %v281_v5  ;;  %p1636_p11 = pneg %p1635_p0 }
  0xa0   : > { %1416 = vmatprep.subr.bf16.mxu0 %v1399_v3  ;;  %p1642_p4 = por %p1641_p10, %p1640_p7 }
  0xa2   : > { %1348 = vmatmul.mubr.msk.f32.vlgmr.msra.gmra.mrb[2].mxu0 %vm287_vm0, %v282_v7  ;;  %p1643_p6 = pnand %p1642_p4, %p1636_p11 }
  0xa3   : > { %1418 = vmatpush3.bf16.msra.mxu0 %v1399_v3  ;;  %1361 = vmatprep.mubr.msk.f32.mxu0 %vm287_vm0, %v612_v6 }
  0xa4   : > { %1424 = vmatprep.subr.bf16.mxu0 %v1399_v3 }
  0xa6   : > { %1362 = vmatmul.mubr.msk.f32.vlgmr.msra.gmra.mrb[4].mxu0 %vm287_vm0, %v613_v8 }
  0xa7   : > { %1426 = vmatpush3.bf16.msra.mxu0 %v1399_v3  ;;  %1375 = vmatprep.mubr.msk.f32.mxu0 %vm287_vm0, %v772_v9 }
  0xa8   : > { %1432 = vmatprep.subr.bf16.mxu0 %v1399_v3 }
  0xaa   : > { %1376 = vmatmul.mubr.msk.f32.vlgmr.msra.gmra.mrb[6].mxu0 %vm287_vm0, %v773_v10 }
  0xab   : > { %1434 = vmatpush3.bf16.msra.mxu0 %v1399_v3  ;;  %1389 = vmatprep.mubr.msk.f32.mxu0 %vm287_vm0, %v932_v11 }
  0xae   : > { %1390 = vmatmul.mubr.msk.f32.vlgmr.msra.gmra.mrb[8].mxu0 %vm287_vm0, %v933_v12 }
 0x171   : > { %v1335_v14 = vpop.f32.mrb[0].mxu0 }
 0x172   : > { %v360_v15 = vpop.f32.mrb[1].mxu0 }
 0x173   : > { %v1403_v16 = vpack.c.bf16 %v1335_v14, %v360_v15 }
 0x175   : > { %1404 = vmatprep.subr.bf16.mxu1 %v1403_v16  ;;  %v1349_v17 = vpop.f32.mrb[2].mxu0 }
 0x176   : > { %1406 = vmatpush3.bf16.msra.mxu1 %v1403_v16  ;;  %v522_v18 = vpop.f32.mrb[3].mxu0 }
 0x177   : > { %v1411_v20 = vpack.c.bf16 %v1349_v17, %v522_v18 }
 0x179   : > { %1341 = vmatmul.mubr.msk.f32.vlgmr.msra.gmra.mrb[0].mxu1 %vm287_vm0, %v286_v19  ;;  %1412 = vmatprep.subr.bf16.mxu1 %v1411_v20  ;;  %v1363_v21 = vpop.f32.mrb[4].mxu0 }
 0x17a   : > { %1414 = vmatpush3.bf16.msra.mxu1 %v1411_v20  ;;  %v686_v22 = vpop.f32.mrb[5].mxu0  ;;  %1354 = vmatprep.mubr.msk.f32.mxu1 %vm287_vm0, %v285_v13 }
 0x17b   : > { %v1419_v23 = vpack.c.bf16 %v1363_v21, %v686_v22 }
 0x17d   : > { %1355 = vmatmul.mubr.msk.f32.vlgmr.msra.gmra.mrb[2].mxu1 %vm287_vm0, %v286_v19  ;;  %1420 = vmatprep.subr.bf16.mxu1 %v1419_v23  ;;  %v1377_v24 = vpop.f32.mrb[6].mxu0 }
 0x17e   : > { %1422 = vmatpush3.bf16.msra.mxu1 %v1419_v23  ;;  %v846_v25 = vpop.f32.mrb[7].mxu0  ;;  %1368 = vmatprep.mubr.msk.f32.mxu1 %vm287_vm0, %v285_v13 }
 0x17f   : > { %v1427_v26 = vpack.c.bf16 %v1377_v24, %v846_v25 }
 0x181   : > { %1369 = vmatmul.mubr.msk.f32.vlgmr.msra.gmra.mrb[4].mxu1 %vm287_vm0, %v286_v19  ;;  %1428 = vmatprep.subr.bf16.mxu1 %v1427_v26  ;;  %v1391_v27 = vpop.f32.mrb[8].mxu0 }
 0x182   : > { %1430 = vmatpush3.bf16.msra.mxu1 %v1427_v26  ;;  %v1006_v28 = vpop.f32.mrb[9].mxu0  ;;  %1382 = vmatprep.mubr.msk.f32.mxu1 %vm287_vm0, %v285_v13 }
 0x183   : > { %v1435_v29 = vpack.c.bf16 %v1391_v27, %v1006_v28 }
 0x185   : > { %1383 = vmatmul.mubr.msk.f32.vlgmr.msra.gmra.mrb[6].mxu1 %vm287_vm0, %v286_v19  ;;  %1436 = vmatprep.subr.bf16.mxu1 %v1435_v29 }
 0x186   : > { %1438 = vmatpush3.bf16.msra.mxu1 %v1435_v29  ;;  %1396 = vmatprep.mubr.msk.f32.mxu1 %vm287_vm0, %v285_v13 }
 0x189   : > { %1397 = vmatmul.mubr.msk.f32.vlgmr.msra.gmra.mrb[8].mxu1 %vm287_vm0, %v286_v19 }
 0x24c   : > { %v1342_v30 = vpop.f32.mrb[0].mxu1 }
 0x24d   : > { %v441_v31 = vpop.f32.mrb[1].mxu1  ;;  %v607_v33 = vmul.f32 %v1342_v30, %v1342_v30 }
 0x24e   : > { %v606_v37 = vmul.f32 %v441_v31, %v441_v31 }
 0x250   : > { %v1356_v32 = vpop.f32.mrb[2].mxu1 }
 0x251   : > { %v609_v34 = vmul.f32 %v1356_v32, %v1356_v32  ;;  %v611_v35 = vmul.f32 %v1356_v32, %v1342_v30  ;;  %v597_v36 = vpop.f32.mrb[3].mxu1 }
 0x252   : > { %v608_v38 = vmul.f32 %v597_v36, %v597_v36  ;;  %v610_v39 = vmul.f32 %v597_v36, %v441_v31 }
 0x253   : > { %v1103_v40 = vadd.f32 %v609_v34, %v607_v33  ;;  %v1093_v53 = vmul.f32 2.0, %v611_v35 }
 0x254   : > { %v1102_v41 = vadd.f32 %v608_v38, %v606_v37  ;;  %v1370_v42 = vpop.f32.mrb[4].mxu1  ;;  %v1092_v58 = vmul.f32 2.0, %v610_v39 }
 0x255   : > { %v771_v43 = vsub.f32 %v1370_v42, %v607_v33  ;;  %v761_v44 = vpop.f32.mrb[5].mxu1  ;;  %v1105_v54 = vadd.f32 0.0001, %v1103_v40  ;;  %v1095_v2 = vadd.f32 0.0001, %v1093_v53 }
 0x256   : > { %v770_v45 = vsub.f32 %v761_v44, %v606_v37  ;;  %v1104_v59 = vadd.f32 0.0001, %v1102_v41  ;;  %v1094_v4 = vadd.f32 0.0001, %v1092_v58 }
 0x258   : > { %v1384_v46 = vpop.f32.mrb[6].mxu1 }
 0x259   : > { %v931_v47 = vsub.f32 %v1384_v46, %v609_v34  ;;  %v921_v48 = vpop.f32.mrb[7].mxu1 }
 0x25a   : > { %v930_v49 = vsub.f32 %v921_v48, %v608_v38 }
 0x25b   : > { %v1107_v50 = vadd.f32 %v931_v47, %v771_v43 }
 0x25c   : > { %v1106_v51 = vadd.f32 %v930_v49, %v770_v45  ;;  %v1398_v52 = vpop.f32.mrb[8].mxu1 }
 0x25d   : > { %v1109_v55 = vadd.f32 0.0009, %v1107_v50  ;;  %v1091_v56 = vsub.f32 %v1398_v52, %v611_v35  ;;  %v1081_v57 = vpop.f32.mrb[9].mxu1 }
 0x25e   : > { %v1108_v60 = vadd.f32 0.0009, %v1106_v51  ;;  %v1090_v61 = vsub.f32 %v1081_v57, %v610_v39 }
 0x25f   : > { %v1111_v62 = vmul.f32 %v1109_v55, %v1105_v54  ;;  %v1097_v63 = vmul.f32 2.0, %v1091_v56 }
 0x260   : > { %v1110_v0 = vmul.f32 %v1108_v60, %v1104_v59  ;;  %v1096_v1 = vmul.f32 2.0, %v1090_v61 }
 0x261   : > { %1513 = vrcp.f32 %v1111_v62  ;;  %v1099_v3 = vadd.f32 0.0009, %v1097_v63 }
 0x262   : > { %1515 = vrcp.f32 %v1110_v0  ;;  %v1098_v5 = vadd.f32 0.0009, %v1096_v1 }
 0x263   : > { %v1101_v6 = vmul.f32 %v1099_v3, %v1095_v2 }
 0x264   : > { %v1100_v7 = vmul.f32 %v1098_v5, %v1094_v4 }
 0x26b   : > { %v1514_v8 = vpop.eup %1513 }
 0x26c   : > { %v1516_v9 = vpop.eup %1515  ;;  %v1115_v10 = vmul.f32 %v1514_v8, %v1101_v6 }
 0x26d   : > { %v1113_v11 = vmul.f32 %v1516_v9, %v1100_v7 }
 0x26e   : > { %v1119_v13 = vsel %vm287_vm0, %v1115_v10, 0.0 }
 0x26f   : > { %v1116_v12 = vsel %vm287_vm0, %v1113_v11, 0.0 }
 0x270   : > { %1117 = vadd.xlane.f32.xlu0 %v1116_v12 }
 0x274   : > { %1120 = vadd.xlane.f32.xlu0 %v1119_v13 }
 0x2fd   : > { %v1118_v14 = vpop.xlane.xlu0 %1117 }
 0x301   : > { %v1121_v15 = vpop.xlane.xlu0 %1120 }
 0x302   : > { %v1122_v16 = vadd.f32 %v1121_v15, %v1118_v14 }
 0x304   : > { %v1123_v17 = vrot.slane %v1122_v16, 4 }
 0x306   : > { %v1124_v18 = vadd.f32 %v1123_v17, %v1122_v16 }
 0x308   : > { %v1125_v19 = vrot.slane %v1124_v18, 2 }
 0x30a   : > { %v1126_v20 = vadd.f32 %v1125_v19, %v1124_v18 }
 0x30c   : > { %v1127_v21 = vrot.slane %v1126_v20, 1 }
 0x30e   : > { %v1128_v22 = vadd.f32 %v1127_v21, %v1126_v20 }
 0x310   : > { %1129 = vst [vmem:[%s278_s0] sm:$0x1] %v1128_v22 }
 0x311   : > { %1646 = shalt.err (!%p1643_p6)
}
 0x312   : > { %s1647_s20 = scalar_lea.hbm %s1999_s14, 16  ;;  %s1651_s5 = scalar_lea.hbm %s2046_s4, 128 }
 0x313   : > { %p1648_p1 = scmp.ne.s32.totalorder %s1999_s14, %s1647_s20  ;;  %p1652_p13 = scmp.lt.u32.totalorder %s1999_s14, %s2046_s4 }
 0x314   : > { %p1653_p3 = scmp.lt.u32.totalorder %s1651_s5, %s1647_s20  ;;  %p1655_p8 = scmp.lt.u32.totalorder %s1647_s20, %s1999_s14 }
 0x315   : > { %p1649_p2 = pnand %p1648_p1, %p2087_p9 }
 0x316   : > { %p1654_p12 = por %p1653_p3, %p1652_p13 }
 0x317   : > { %p1650_p5 = pneg %p1649_p2 }
 0x318   : > { %p1656_p0 = por %p1655_p8, %p1654_p12 }
 0x31a   : > { %p1657_p11 = pnand %p1656_p0, %p1650_p5 }
 0x31c   : > { %1660 = shalt.err (!%p1657_p11)
}
 0x31d   : > { %1451 = dma.vmem_to_hbm [thread:$0]  (%p2087_p9), %s2001_s2, 16, %s1999_s14, %s1131_s6  }
 0x31e PF: > { %p1476_p7 = scmp.ge.s32.totalorder %s1707_s18, 2  ;;  %s1155_s23 = sand.u32 1, %s1695_s15  }
 0x31f   : > { %p2088_p10 = scmp.ne.s32.totalorder %s2066_s28, 0  ;;  %s1156_s29 = scalar_lea.sflag [#allocation4], %s1155_s23 }
 0x321   : > { %p1468_p4 = pnand %p1476_p7, %p2088_p10 }
 0x323   : > { %1690 = dma.done.wait (!%p1468_p4), %s1156_s29, 16  }
 0x324   : > { %1692 = vsyncadd (!%p1468_p4), %s1156_s29, 4294967280  ;;  %s2089_s30 = sld [smem:[#allocation14_spill]]  ;;  %s2090_s17 = sld [smem:[#allocation15_spill]] }
 0x325   : > { %p16_p6 = scmp.ge.s32.totalorder %s1766_s21, 10   ;;  %s2091_s15 = smov %s1699_s16 }
 0x326   : > { %s2093_s18 = smov %s1766_s21 }
 0x327   :  { %18 = sbr.rel (!%p16_p6) target bundleno = 8 (0x8), region = 99 }
 0x32a   : > { %s2092_s16 = smov %s2089_s30 }
 0x32e   :  { %1160 = vsyncpa [#allocation3], 1 }
 0x32f   :  { %1162 = vsyncpa [#allocation3 + $0x1], 1 }
 0x330   :  { %1163 = vsyncpa [#allocation6], 1 }
 0x331   :  { %1164 = vsyncpa [#allocation4], 1 }
 0x332   :  { %1166 = vsyncpa [#allocation4 + $0x1], 1 }

</bundles_post_ra>
